<compile_context>
chip_gen: v6e
topology: v6e:2x2x1
jax: 0.10.0
libtpu: 0.0.40
codegen_flags: <defaults>
</compile_context>

<pallas_src>
import functools

import jax
import jax.numpy as jnp
from jax import lax
from jax.experimental import pallas as pl
from jax.experimental.pallas import tpu as pltpu


_HIGHEST = lax.Precision.HIGHEST

# Conservative VMEM working-set budget for auto tile sizing: stays well under
# the 32 MiB default scoped limit (and v7x's 64 MiB physical VMEM) including
# double-buffered pipeline blocks, so no vmem_limit override is needed.
_ATTN_VMEM_BUDGET = 20 * 1024 * 1024


# ---------------------------------------------------------------------------
# Helpers
# ---------------------------------------------------------------------------

def _mish(x):
    # mish(x) = x * tanh(softplus(x)) = x * (t - 1) / (t + 1),  t = (1 + e^x)^2
    # -> one EUP transcendental (exp) + one divide instead of exp + log1p + tanh.
    # The conv kernel is HBM-bound, so the exact divide is free; an approximate
    # reciprocal here compounds across the 5 stacked layers.
    xc = jnp.minimum(x, 20.0)              # exp-overflow guard; mish(x) ~ x there
    e = jnp.exp(xc)
    t = (1.0 + e) * (1.0 + e)
    y = x * (t - 1.0) / (t + 1.0)
    return jnp.where(x > 20.0, x, y)


def _pick_tile(n, cap):
    """Largest multiple of 128 <= cap dividing n (n itself if small/ragged)."""
    if n <= cap or n % 128 != 0:
        return n
    t = (cap // 128) * 128
    while n % t != 0:
        t -= 128
    return t


def _channel_mix(w, x):
    # w: (Cout, Cin), x: (Cin, TN) -> (Cout, TN)
    c_in = x.shape[0]
    if c_in < 8:
        # Tiny contraction dim (first layer, Cin=3): outer-product MACs on the
        # VPU instead of a heavily padded MXU matmul.
        acc = w[:, 0:1] * x[0:1, :]
        for c in range(1, c_in):
            acc = acc + w[:, c:c + 1] * x[c:c + 1, :]
        return acc
    return jnp.dot(w, x, preferred_element_type=jnp.float32, precision=_HIGHEST)


# ---------------------------------------------------------------------------
# Kernel 1: 1x1 conv (channel mix) + Mish, tiled over N
# ---------------------------------------------------------------------------

def _conv_mish_kernel(x_ref, w_ref, o_ref):
    x = x_ref[0].astype(jnp.float32)                       # (Cin, TN)
    o_ref[0] = _mish(_channel_mix(w_ref[...], x)).astype(o_ref.dtype)


def _conv_mish_add_kernel(xa_ref, xb_ref, w_ref, o_ref):
    # Fused residual add of the two inputs feeding Self_Attn3 (x2 + x1).
    x = (xa_ref[0] + xb_ref[0]).astype(jnp.float32)
    o_ref[0] = _mish(_channel_mix(w_ref[...], x)).astype(o_ref.dtype)


def conv1x1_mish(x, w, x_add=None, *, block_n=None):
    """key = Mish(W @ (x [+ x_add])).  x: (B, Cin, N), w: (Cout, Cin)."""
    b, c_in, n = x.shape
    c_out = w.shape[0]
    tn = block_n if block_n is not None else _pick_tile(n, 2048)
    assert n % tn == 0, (n, tn)
    grid = (b, n // tn)

    x_spec = pl.BlockSpec((1, c_in, tn), lambda i, j: (i, 0, j))
    w_spec = pl.BlockSpec((c_out, c_in), lambda i, j: (0, 0))
    o_spec = pl.BlockSpec((1, c_out, tn), lambda i, j: (i, 0, j))
    out_shape = jax.ShapeDtypeStruct((b, c_out, n), x.dtype)
    cparams = pltpu.CompilerParams(dimension_semantics=("parallel", "parallel"))

    if x_add is None:
        return pl.pallas_call(
            _conv_mish_kernel,
            out_shape=out_shape,
            grid_spec=pltpu.PrefetchScalarGridSpec(
                num_scalar_prefetch=0, grid=grid,
                in_specs=[x_spec, w_spec], out_specs=o_spec),
            compiler_params=cparams,
        )(x, w)

    return pl.pallas_call(
        _conv_mish_add_kernel,
        out_shape=out_shape,
        grid_spec=pltpu.PrefetchScalarGridSpec(
            num_scalar_prefetch=0, grid=grid,
            in_specs=[x_spec, x_spec, w_spec], out_specs=o_spec),
        compiler_params=cparams,
    )(x, x_add, w)


# ---------------------------------------------------------------------------
# Kernel 2: self-attention over points (transposed domain, lane-dense in TQ)
#   out[:, i] = beta * sum_j softmax_j(key[:,i].key[:,j]) * key[:, j] + key[:, i]
# ---------------------------------------------------------------------------

def _attn_single_kernel(kq_ref, kk_ref, beta_ref, o_ref):
    # Single pass: the full key row (D, N) is resident in VMEM, no online
    # softmax bookkeeping.
    q = kq_ref[0].astype(jnp.float32)                      # (D, TQ)
    k = kk_ref[0].astype(jnp.float32)                      # (D, N)
    # s[j, i] = sum_d key[d, j] * key[d, i]   (scores transposed: (N, TQ))
    s = lax.dot_general(k, q, (((0,), (0,)), ((), ())),
                        preferred_element_type=jnp.float32,
                        precision=_HIGHEST)
    m = jnp.max(s, axis=0, keepdims=True)                  # (1, TQ)
    p = jnp.exp(s - m)                                     # (N, TQ)
    l = jnp.sum(p, axis=0, keepdims=True)                  # (1, TQ)
    out_x = jnp.dot(k, p, preferred_element_type=jnp.float32,
                    precision=_HIGHEST)                    # (D, TQ)
    # beta folded into the (exact) reciprocal of the denominator.
    o_ref[0] = (out_x * (beta_ref[0] / l) + q).astype(o_ref.dtype)


def _attn_flash_kernel(kq_ref, kk_ref, beta_ref, o_ref, m_sc, l_sc, acc_sc):
    # Flash-style fallback for very large N (online softmax over key tiles).
    ik = pl.program_id(2)

    @pl.when(ik == 0)
    def _():
        m_sc[...] = jnp.full(m_sc.shape, -jnp.inf, dtype=jnp.float32)
        l_sc[...] = jnp.zeros(l_sc.shape, dtype=jnp.float32)
        acc_sc[...] = jnp.zeros(acc_sc.shape, dtype=jnp.float32)

    q = kq_ref[0].astype(jnp.float32)                      # (D, TQ)
    k = kk_ref[0].astype(jnp.float32)                      # (D, TK)
    s = lax.dot_general(k, q, (((0,), (0,)), ((), ())),
                        preferred_element_type=jnp.float32,
                        precision=_HIGHEST)                # (TK, TQ)

    m_prev = m_sc[...]                                     # (1, TQ)
    m_new = jnp.maximum(m_prev, jnp.max(s, axis=0, keepdims=True))
    alpha = jnp.exp(m_prev - m_new)
    p = jnp.exp(s - m_new)                                 # (TK, TQ)
    l_sc[...] = alpha * l_sc[...] + jnp.sum(p, axis=0, keepdims=True)
    acc_sc[...] = alpha * acc_sc[...] + jnp.dot(
        k, p, preferred_element_type=jnp.float32, precision=_HIGHEST)
    m_sc[...] = m_new

    @pl.when(ik == pl.num_programs(2) - 1)
    def _():
        o_ref[0] = (acc_sc[...] * (beta_ref[0] / l_sc[...]) + q).astype(o_ref.dtype)


def _attn_single_bytes(d, n, tq):
    # q-in + out (double-buffered) + resident K (double-buffered) + s/p temps.
    return 4 * (4 * d * tq + 2 * d * n + 3 * n * tq)


def self_attn_mix(key, beta, *, block_q=None, block_k=None):
    """out = beta * (key @ softmax(key^T key, -1)^T) + key, per batch element.

    key: (B, D, N), beta: (1,) float32.
    """
    b, d, n = key.shape
    tq = block_q if block_q is not None else _pick_tile(n, 512)
    assert n % tq == 0, (n, tq)

    if block_k is None:
        single = _attn_single_bytes(d, n, tq) <= _ATTN_VMEM_BUDGET
        tk = n if single else _pick_tile(n, 512)
    else:
        tk = block_k
        single = tk == n
    assert n % tk == 0, (n, tk)

    kq_spec = pl.BlockSpec((1, d, tq), lambda i, iq, *_: (i, 0, iq))
    o_spec = pl.BlockSpec((1, d, tq), lambda i, iq, *_: (i, 0, iq))
    beta_spec = pl.BlockSpec(memory_space=pltpu.MemorySpace.SMEM)
    out_shape = jax.ShapeDtypeStruct((b, d, n), key.dtype)

    if single:
        kk_spec = pl.BlockSpec((1, d, n), lambda i, iq: (i, 0, 0))
        return pl.pallas_call(
            _attn_single_kernel,
            out_shape=out_shape,
            grid_spec=pltpu.PrefetchScalarGridSpec(
                num_scalar_prefetch=0,
                grid=(b, n // tq),
                in_specs=[kq_spec, kk_spec, beta_spec],
                out_specs=o_spec),
            compiler_params=pltpu.CompilerParams(
                dimension_semantics=("parallel", "parallel")),
        )(key, key, beta)

    kk_spec = pl.BlockSpec((1, d, tk), lambda i, iq, ik: (i, 0, ik))
    return pl.pallas_call(
        _attn_flash_kernel,
        out_shape=out_shape,
        grid_spec=pltpu.PrefetchScalarGridSpec(
            num_scalar_prefetch=0,
            grid=(b, n // tq, n // tk),
            in_specs=[kq_spec, kk_spec, beta_spec],
            out_specs=o_spec,
            scratch_shapes=[
                pltpu.VMEM((1, tq), jnp.float32),   # running max   (lane-dense)
                pltpu.VMEM((1, tq), jnp.float32),   # running denom (lane-dense)
                pltpu.VMEM((d, tq), jnp.float32),   # running numerator
            ]),
        compiler_params=pltpu.CompilerParams(
            dimension_semantics=("parallel", "parallel", "arbitrary")),
    )(key, key, beta)


# ---------------------------------------------------------------------------
# Kernel 3: fused channel-concat + max/mean pooling over points (no concat
# materialization: each activation reduces into its channel slice).
# ---------------------------------------------------------------------------

def _pool_kernel(x0_ref, x1_ref, x2_ref, x3_ref, x4_ref, o_ref,
                 max_sc, sum_sc, *, offsets, sizes, c_total, inv_n):
    j = pl.program_id(1)

    @pl.when(j == 0)
    def _():
        max_sc[...] = jnp.full(max_sc.shape, -jnp.inf, dtype=jnp.float32)
        sum_sc[...] = jnp.zeros(sum_sc.shape, dtype=jnp.float32)

    for ref, off, c in zip((x0_ref, x1_ref, x2_ref, x3_ref, x4_ref),
                           offsets, sizes):
        v = ref[0].astype(jnp.float32)                      # (C_i, TN)
        max_sc[off:off + c, :] = jnp.maximum(
            max_sc[off:off + c, :], jnp.max(v, axis=1, keepdims=True))
        sum_sc[off:off + c, :] = (
            sum_sc[off:off + c, :] + jnp.sum(v, axis=1, keepdims=True))

    @pl.when(j == pl.num_programs(1) - 1)
    def _():
        # Final (2*C_total, 1) store runs once per batch element (negligible).
        o_ref[0, 0:c_total, :] = max_sc[...].astype(o_ref.dtype)
        o_ref[0, c_total:2 * c_total, :] = (sum_sc[...] * inv_n).astype(o_ref.dtype)


def max_mean_pool(xs, *, block_n=None):
    """concat([max_N(cat_C(xs)), mean_N(cat_C(xs))], axis=1) -> (B, 2*C_total)."""
    b, _, n = xs[0].shape
    sizes = tuple(x.shape[1] for x in xs)
    c_total = sum(sizes)
    offsets, off = [], 0
    for c in sizes:
        offsets.append(off)
        off += c
    offsets = tuple(offsets)

    tn = block_n if block_n is not None else _pick_tile(n, 2048)
    assert n % tn == 0, (n, tn)
    grid = (b, n // tn)

    in_specs = [pl.BlockSpec((1, c, tn), lambda i, j: (i, 0, j)) for c in sizes]
    o_spec = pl.BlockSpec((1, 2 * c_total, 1), lambda i, j: (i, 0, 0))

    pooled = pl.pallas_call(
        functools.partial(_pool_kernel, offsets=offsets, sizes=sizes,
                          c_total=c_total, inv_n=1.0 / n),
        out_shape=jax.ShapeDtypeStruct((b, 2 * c_total, 1), xs[0].dtype),
        grid_spec=pltpu.PrefetchScalarGridSpec(
            num_scalar_prefetch=0,
            grid=grid,
            in_specs=in_specs,
            out_specs=o_spec,
            scratch_shapes=[
                pltpu.VMEM((c_total, 1), jnp.float32),   # running max
                pltpu.VMEM((c_total, 1), jnp.float32),   # running sum
            ]),
        compiler_params=pltpu.CompilerParams(
            dimension_semantics=("parallel", "arbitrary")),
    )(*xs)
    return pooled.reshape(b, 2 * c_total)


# ---------------------------------------------------------------------------
# Full forward
# ---------------------------------------------------------------------------

def pointnet_sa_features(x, params, *, conv_block_n=None,
                         attn_block_q=None, attn_block_k=None):
    """Pallas forward of PointNetSAFeatures.

    x: (B, N, 3) ('bnc') or (B, 3, N) ('bcn').
    params: w0..w4 as (Cout, Cin) conv weights, beta0..beta4 as (1,) float32.
    Returns (B, 1024) = concat(max over points, mean over points).
    """
    if x.shape[1] != 3:                  # matches the PyTorch permute for 'bnc'
        x = jnp.transpose(x, (0, 2, 1))

    def layer(inp, w, beta, inp_add=None):
        key = conv1x1_mish(inp, w, inp_add, block_n=conv_block_n)
        return self_attn_mix(key, beta, block_q=attn_block_q, block_k=attn_block_k)

    x0 = layer(x, params["w0"], params["beta0"])
    x1 = layer(x0, params["w1"], params["beta1"])
    x2 = layer(x1, params["w2"], params["beta2"])
    x3 = layer(x2, params["w3"], params["beta3"], inp_add=x1)   # Self_Attn3(x2 + x1)
    x4 = layer(x3, params["w4"], params["beta4"])
    return max_mean_pool([x0, x1, x2, x3, x4], block_n=conv_block_n)


# ---------------------------------------------------------------------------
# Pure-JAX reference (mirrors the PyTorch forward; HIGHEST precision so the
# comparison is not polluted by default bf16 MXU passes)
# ---------------------------------------------------------------------------

def _mish_ref(v):
    return v * jnp.tanh(jax.nn.softplus(v))


def _self_attn_ref(x, w, beta):
    key = _mish_ref(jnp.einsum("oc,bcn->bon", w, x, precision=_HIGHEST))
    energy = jnp.einsum("bdi,bdj->bij", key, key, precision=_HIGHEST)
    attn = jax.nn.softmax(energy, axis=-1)
    out_x = jnp.einsum("bdj,bij->bdi", key, attn, precision=_HIGHEST)
    return beta * out_x + key


def _reference_forward(x, params):
    if x.shape[1] != 3:
        x = jnp.transpose(x, (0, 2, 1))
    x0 = _self_attn_ref(x, params["w0"], params["beta0"][0])
    x1 = _self_attn_ref(x0, params["w1"], params["beta1"][0])
    x2 = _self_attn_ref(x1, params["w2"], params["beta2"][0])
    x3 = _self_attn_ref(x2 + x1, params["w3"], params["beta3"][0])
    x4 = _self_attn_ref(x3, params["w4"], params["beta4"][0])
    x5 = jnp.concatenate([x0, x1, x2, x3, x4], axis=1)
    return jnp.concatenate([jnp.max(x5, axis=2), jnp.mean(x5, axis=2)], axis=1)


if __name__ == "__main__":
    B, N = 2, 256
    dims = [(3, 32), (32, 64), (64, 64), (64, 128), (128, 224)]

    root = jax.random.PRNGKey(0)
    kx, *kws = jax.random.split(root, 1 + len(dims))
    x = jax.random.normal(kx, (B, N, 3), dtype=jnp.float32)   # 'bnc' input

    params = {}
    # beta is nn.Parameter(zeros(1)) at init; use non-zero values so the
    # attention path is actually exercised by the test.
    betas = [0.1, 0.2, 0.3, 0.4, 0.5]
    for i, ((c_in, c_out), kk) in enumerate(zip(dims, kws)):
        params[f"w{i}"] = jax.random.normal(
            kk, (c_out, c_in), dtype=jnp.float32) * (1.0 / jnp.sqrt(float(c_in)))
        params[f"beta{i}"] = jnp.array([betas[i]], dtype=jnp.float32)

    ref = _reference_forward(x, params)

    # Default path: single-pass attention (key row resident in VMEM), auto tiles.
    out = jax.block_until_ready(pointnet_sa_features(x, params))
    assert out.shape == (B, 1024), out.shape
    assert jnp.allclose(out, ref, atol=2e-2, rtol=2e-2), (
        "single-pass mismatch vs reference, max abs err = "
        + str(float(jnp.max(jnp.abs(out - ref)))))

    # Forced small tiles: exercises the multi-tile conv/pool accumulation and the
    # flash (online-softmax) attention fallback path.
    out_f = jax.block_until_ready(pointnet_sa_features(
        x, params, conv_block_n=128, attn_block_q=128, attn_block_k=128))
    assert jnp.allclose(out_f, ref, atol=2e-2, rtol=2e-2), (
        "flash-path mismatch vs reference, max abs err = "
        + str(float(jnp.max(jnp.abs(out_f - ref)))))

    print("KERNEL_OK")
</pallas_src>

<mosaic_0001>
module attributes {stable_mosaic.version = 11 : i64} {
  func.func @_conv_mish_kernel(%arg0: i32, %arg1: i32, %arg2: memref<1x3x256xf32, #tpu.memory_space<vmem>>, %arg3: memref<32x3xf32, #tpu.memory_space<vmem>>, %arg4: memref<1x32x256xf32, #tpu.memory_space<vmem>>) attributes {dimension_semantics = [#tpu.dimension_semantics<parallel>, #tpu.dimension_semantics<parallel>], iteration_bounds = array<i64: 2, 1>, scalar_prefetch = 0 : i64, scratch_operands = 0 : i64, tpu.core_type = #tpu.core_type<tc>, window_params = [{transform_indices = @transform_0, window_bounds = array<i64: 1, 3, 256>}, {pipeline_mode = #tpu.pipeline_mode<synchronous>, transform_indices = @transform_1, window_bounds = array<i64: 32, 3>}, {transform_indices = @transform_2, window_bounds = array<i64: 1, 32, 256>}]} {
    %c0 = arith.constant 0 : index
    %c0_0 = arith.constant 0 : index
    %c0_1 = arith.constant 0 : index
    %0 = vector.load %arg2[%c0, %c0_0, %c0_1] : memref<1x3x256xf32, #tpu.memory_space<vmem>>, vector<1x3x256xf32>
    %1 = vector.shape_cast %0 : vector<1x3x256xf32> to vector<3x256xf32>
    %c0_2 = arith.constant 0 : index
    %c0_3 = arith.constant 0 : index
    %2 = vector.load %arg3[%c0_2, %c0_3] : memref<32x3xf32, #tpu.memory_space<vmem>>, vector<32x3xf32>
    %3 = vector.extract_strided_slice %2 {offsets = [0, 0], sizes = [32, 1], strides = [1, 1]} : vector<32x3xf32> to vector<32x1xf32>
    %4 = vector.extract_strided_slice %1 {offsets = [0, 0], sizes = [1, 256], strides = [1, 1]} : vector<3x256xf32> to vector<1x256xf32>
    %5 = vector.broadcast %3 : vector<32x1xf32> to vector<32x256xf32>
    %6 = vector.broadcast %4 : vector<1x256xf32> to vector<32x256xf32>
    %7 = arith.mulf %5, %6 : vector<32x256xf32>
    %8 = vector.extract_strided_slice %2 {offsets = [0, 1], sizes = [32, 1], strides = [1, 1]} : vector<32x3xf32> to vector<32x1xf32>
    %9 = vector.extract_strided_slice %1 {offsets = [1, 0], sizes = [1, 256], strides = [1, 1]} : vector<3x256xf32> to vector<1x256xf32>
    %10 = vector.broadcast %8 : vector<32x1xf32> to vector<32x256xf32>
    %11 = vector.broadcast %9 : vector<1x256xf32> to vector<32x256xf32>
    %12 = arith.mulf %10, %11 : vector<32x256xf32>
    %13 = arith.addf %7, %12 : vector<32x256xf32>
    %14 = vector.extract_strided_slice %2 {offsets = [0, 2], sizes = [32, 1], strides = [1, 1]} : vector<32x3xf32> to vector<32x1xf32>
    %15 = vector.extract_strided_slice %1 {offsets = [2, 0], sizes = [1, 256], strides = [1, 1]} : vector<3x256xf32> to vector<1x256xf32>
    %16 = vector.broadcast %14 : vector<32x1xf32> to vector<32x256xf32>
    %17 = vector.broadcast %15 : vector<1x256xf32> to vector<32x256xf32>
    %18 = arith.mulf %16, %17 : vector<32x256xf32>
    %19 = arith.addf %13, %18 : vector<32x256xf32>
    %cst = arith.constant 2.000000e+01 : f32
    %20 = vector.broadcast %cst : f32 to vector<32x256xf32>
    %21 = arith.minimumf %19, %20 : vector<32x256xf32>
    %22 = math.exp %21 : vector<32x256xf32>
    %cst_4 = arith.constant 1.000000e+00 : f32
    %23 = vector.broadcast %cst_4 : f32 to vector<32x256xf32>
    %24 = arith.addf %23, %22 : vector<32x256xf32>
    %cst_5 = arith.constant 1.000000e+00 : f32
    %25 = vector.broadcast %cst_5 : f32 to vector<32x256xf32>
    %26 = arith.addf %25, %22 : vector<32x256xf32>
    %27 = arith.mulf %24, %26 : vector<32x256xf32>
    %cst_6 = arith.constant 1.000000e+00 : f32
    %28 = vector.broadcast %cst_6 : f32 to vector<32x256xf32>
    %29 = arith.subf %27, %28 : vector<32x256xf32>
    %30 = arith.mulf %19, %29 : vector<32x256xf32>
    %cst_7 = arith.constant 1.000000e+00 : f32
    %31 = vector.broadcast %cst_7 : f32 to vector<32x256xf32>
    %32 = arith.addf %27, %31 : vector<32x256xf32>
    %33 = arith.divf %30, %32 : vector<32x256xf32>
    %cst_8 = arith.constant 2.000000e+01 : f32
    %34 = vector.broadcast %cst_8 : f32 to vector<32x256xf32>
    %35 = arith.cmpf ogt, %19, %34 : vector<32x256xf32>
    %36 = arith.select %35, %19, %33 : vector<32x256xi1>, vector<32x256xf32>
    %c0_9 = arith.constant 0 : index
    %c0_10 = arith.constant 0 : index
    %c0_11 = arith.constant 0 : index
    %37 = vector.load %arg4[%c0_9, %c0_10, %c0_11] : memref<1x32x256xf32, #tpu.memory_space<vmem>>, vector<1x32x256xf32>
    %38 = vector.shape_cast %37 : vector<1x32x256xf32> to vector<32x256xf32>
    %39 = vector.shape_cast %36 : vector<32x256xf32> to vector<1x32x256xf32>
    tpu.vector_store %arg4[%c0_9, %c0_10, %c0_11], %39 {strides = array<i32>} : memref<1x32x256xf32, #tpu.memory_space<vmem>>, vector<1x32x256xf32>,
    return
  }
  func.func @transform_0(%arg0: i32, %arg1: i32) -> (i32, i32, i32) {
    %c0_i32 = arith.constant 0 : i32
    %c0_i32_0 = arith.constant 0 : i32
    return %arg0, %c0_i32, %arg1 : i32, i32, i32
  }
  func.func @transform_1(%arg0: i32, %arg1: i32) -> (i32, i32) {
    %c0_i32 = arith.constant 0 : i32
    %c0_i32_0 = arith.constant 0 : i32
    %c0_i32_1 = arith.constant 0 : i32
    return %c0_i32, %c0_i32_0 : i32, i32
  }
  func.func @transform_2(%arg0: i32, %arg1: i32) -> (i32, i32, i32) {
    %c0_i32 = arith.constant 0 : i32
    %c0_i32_0 = arith.constant 0 : i32
    return %arg0, %c0_i32, %arg1 : i32, i32, i32
  }
}

</mosaic_0001>

<bundles_post_ra>
// kernel: tpu_custom_call.1
= control target key start
LH: loop header
LB: loop body
LE: loop exit
PB: predicated region body
PF: predicated region fallthrough
CT: control target
= control target key end

     0   :  { %7 = vsyncpa [#allocation3], 0  ;;  %s933_s0 = inlined_call_operand.vmem [shape: f32[2,3,256], index: 0, kind: input, shape index: {}]   ;;  %s934_s1 = inlined_call_operand.vmem [shape: f32[32,3], index: 1, kind: input, shape index: {}]   ;;  %s935_s2 = inlined_call_operand.hbm [shape: f32[2,32,256], index: 2, kind: output, shape index: {}]  }
   0x1   :  { %9 = vsyncpa [#allocation3 + $0x1], 0  ;;  %s744_s9 = smov 0   ;;  %s746_s10 = smov 0  }
   0x2   :  { %s748_s11 = smov 0   ;;  %s750_s12 = smov 0  }
   0x3   :  { %s752_s13 = smov 0   ;;  %s754_s14 = smov 0  }
   0x4 LB: > { %s524_s15 = sadd.s32 4294967295, %s721_s14   ;;  %s525_s16 = sadd.s32 4294967294, %s721_s14   ;;  %s721_s14 = sphi %s754_s14, %s15_s14   ;;  %s717_s13 = sphi %s752_s13, %s942_s13   ;;  %s713_s12 = sphi %s750_s12, %s941_s12   ;;  %s709_s11 = sphi %s748_s11, %s940_s11   ;;  %s705_s10 = sphi %s746_s10, %s939_s10   ;;  %s701_s9 = sphi %s744_s9, %s938_s9  }
   0x5   : > { %s27_s17 = sadd.s32 1, %s717_s13  ;;  %s85_s18 = sadd.s32 1, %s709_s11 }
   0x6   : > { %p29_p0 = scmp.ge.s32.totalorder %s27_s17, 2  ;;  %p95_p1 = scmp.ne.s32.totalorder %s709_s11, %s705_s10 }
   0x7   : > { %p96_p2 = scmp.eq.s32.totalorder %s524_s15, 1  ;;  %p101_p3 = scmp.ne.s32.totalorder %s705_s10, %s701_s9 }
   0x8   : > { %s944_s17 = smov (%p29_p0, %s27_s17), 0  ;;  %p102_p5 = scmp.eq.s32.totalorder %s525_s16, 1 }
   0x9   : > { %p784_p4 = por %p96_p2, %p95_p1  ;;  %s80_s20 = ssub.s32 %s717_s13, %s944_s17 }
   0xa   : > { %p528_p6 = scmp.ge.s32.totalorder %s721_s14, 1  ;;  %p83_p7 = scmp.eq.s32.totalorder %s80_s20, 0 }
   0xb   : > { %p791_p8 = por %p102_p5, %p101_p3  ;;  %p136_p9 = scmp.lt.s32.totalorder %s721_s14, 3 }
   0xc   : > { %s797_s22 = scalar_select %p83_p7, %s709_s11, %s85_s18  }
   0xd   : > { %p137_p10 = pnand %p528_p6, %p136_p9 }
   0xe   : > { %p163_p11 = scmp.lt.s32.totalorder (!%p137_p10), %s713_s12, 1  ;;  %s159_s8 = sand.u32 (!%p137_p10), 1, %s705_s10  }
   0xf   : > { %140 = sbr.rel (%p137_p10) target bundleno = 232 (0xe8), region = 28  ;;  %s529_s15 = sshll.u32 (!%p137_p10), %s159_s8, 6 }
  0x10   : > { %s851_s16 = scalar_lea.vmem (!%p137_p10), [#allocation2], %s529_s15  ;;  %s546_s18 = sshll.u32 (!%p137_p10), %s713_s12, 10 }
  0x11   : > { %s445_s20 = sshll.u32 (!%p137_p10), %s851_s16, 4  ;;  %s876_s24 = scalar_lea.hbm (!%p137_p10), %s935_s2, %s546_s18  ;;  %s878_s20 = int_to_ptr.vmem [resolvable:$true] %s445_s20 }
  0x12   : > { %s888_s25 = scalar_lea.sflag (!%p137_p10), [#allocation3], %s159_s8  ;;  %s645_s26 = scalar_lea.vmem (!%p137_p10), %s878_s20, 1024 }
  0x13   : > { %p646_p12 = scmp.ne.s32.totalorder (!%p137_p10), %s878_s20, %s645_s26  ;;  %s726_s27 = smov (!%p137_p10), [#allocation2]  }
  0x14   : > { %v176_v0 = vld [vmem:[%s934_s1 + $0x10] sm:$0xff]  ;;  %v174_v1 = vld [vmem:[%s934_s1] sm:$0xff]  ;;  %v723_v2 = vmov 0   ;;  %v177_v3 = vld [vmem:[%s934_s1 + $0x18] sm:$0xff]  ;;  %v724_v5 = vmov 1   ;;  %v725_v6 = vmov 2   ;;  %v199_v7 = vlaneseq }
  0x15   : > { %608 = vset.pattern.permute.xlu1 %v723_v2  ;;  %607 = vset.pattern.permute.xlu0 %v723_v2  ;;  %v175_v4 = vld [vmem:[%s934_s1 + $0x8] sm:$0xff]  ;;  %s164_s3 = scalar_select %p163_p11, %s713_s12, 1 }
  0x16   : > { %190 = vperm.xlu1 %608, %v176_v0   ;;  %180 = vperm.xlu0 %607, %v174_v1   ;;  %v200_v8 = vshrl.u32 %v199_v7, 7  ;;  %p647_p13 = pnand %p646_p12, %p784_p4  ;;  %s649_s28 = sshll.u32 %s726_s27, 4  ;;  %s650_s28 = int_to_ptr.vmem [resolvable:$false] %s649_s28 }
  0x17   : > { %s545_s4 = sshll.u32 %s164_s3, 3  ;;  %s651_s29 = scalar_lea.vmem %s650_s28, 2048 }
  0x18   : > { %s170_s7 = scalar_lea.vmem %s933_s0, %s545_s4  ;;  %v243_v11 = vsub.s32 1, %v200_v8  ;;  %v247_v12 = vsub.s32 5, %v200_v8  ;;  %v201_v13 = vsub.s32 0, %v200_v8  ;;  %v205_v14 = vsub.s32 4, %v200_v8  ;;  %p648_p0 = pneg %p647_p13 }
  0x19   : > { %v173_v15 = vld [vmem:[%s170_s7] sm:$0x77]  ;;  %v293_v22 = vsub.s32 2, %v200_v8  ;;  %v297_v23 = vsub.s32 6, %v200_v8  ;;  %p652_p1 = scmp.lt.s32.totalorder %s878_s20, %s650_s28  ;;  %p653_p2 = scmp.lt.s32.totalorder %s651_s29, %s645_s26 }
  0x1a   : > { %195 = vperm.xlu1 %608, %v177_v3   ;;  %185 = vperm.xlu0 %607, %v175_v4   ;;  %v244_v18 = vrot.slane %v173_v15, %v243_v11  ;;  %v248_v19 = vrot.slane %v173_v15, %v247_v12  ;;  %v202_v20 = vrot.slane %v173_v15, %v201_v13 }
  0x1b   : > { %v206_v21 = vrot.slane %v173_v15, %v205_v14  ;;  %v294_v30 = vrot.slane %v173_v15, %v293_v22  ;;  %v298_v31 = vrot.slane %v173_v15, %v297_v23  ;;  %p654_p3 = por %p653_p2, %p652_p1 }
  0x1c   : > { %v254_v26 = vrot.slane %v244_v18, %v243_v11  ;;  %v258_v27 = vrot.slane %v248_v19, %v243_v11  ;;  %v212_v28 = vrot.slane %v202_v20, %v201_v13 }
  0x1d   : > { %v216_v29 = vrot.slane %v206_v21, %v201_v13  ;;  %v304_v42 = vrot.slane %v294_v30, %v293_v22  ;;  %v308_v43 = vrot.slane %v298_v31, %v293_v22  ;;  %p655_p5 = pnand %p654_p3, %p648_p0 }
  0x1e   : > { %610 = vset.pattern.permute.xlu1 %v724_v5  ;;  %609 = vset.pattern.permute.xlu0 %v724_v5 }
  0x1f   : > { %230 = vperm.xlu1 %610, %v175_v4   ;;  %226 = vperm.xlu0 %609, %v174_v1  }
  0x23   : > { %234 = vperm.xlu1 %610, %v176_v0   ;;  %238 = vperm.xlu0 %609, %v177_v3  }
  0x27   : > { %611 = vset.pattern.permute.xlu1 %v725_v6  ;;  %612 = vset.pattern.permute.xlu0 %v725_v6 }
  0x28   : > { %276 = vperm.xlu1 %611, %v174_v1   ;;  %280 = vperm.xlu0 %612, %v175_v4  }
  0x2c   : > { %284 = vperm.xlu1 %611, %v176_v0  }
  0x30   : > { %288 = vperm.xlu1 %611, %v177_v3  }
  0x91   : > { %v191_v9 = vpop.permute.xlu1 %190  ;;  %v181_v10 = vpop.permute.xlu0 %180 }
  0x92   : > { %v217_v32 = vmul.f32 %v212_v28, %v181_v10  ;;  %v218_v33 = vmul.f32 %v216_v29, %v181_v10  ;;  %v221_v60 = vmul.f32 %v212_v28, %v191_v9  ;;  %v222_v61 = vmul.f32 %v216_v29, %v191_v9 }
  0x95   : > { %v196_v16 = vpop.permute.xlu1 %195  ;;  %v186_v17 = vpop.permute.xlu0 %185 }
  0x96   : > { %v219_v34 = vmul.f32 %v212_v28, %v186_v17  ;;  %v220_v35 = vmul.f32 %v216_v29, %v186_v17  ;;  %v223_v12 = vmul.f32 %v212_v28, %v196_v16  ;;  %v224_v13 = vmul.f32 %v216_v29, %v196_v16 }
  0x9a   : > { %v231_v24 = vpop.permute.xlu1 %230  ;;  %v227_v25 = vpop.permute.xlu0 %226 }
  0x9b   : > { %v261_v38 = vmul.f32 %v254_v26, %v231_v24  ;;  %v262_v39 = vmul.f32 %v258_v27, %v231_v24  ;;  %v259_v40 = vmul.f32 %v254_v26, %v227_v25  ;;  %v260_v41 = vmul.f32 %v258_v27, %v227_v25 }
  0x9d   : > { %v269_v44 = vadd.f32 %v261_v38, %v219_v34  ;;  %v270_v45 = vadd.f32 %v262_v39, %v220_v35  ;;  %v267_v46 = vadd.f32 %v259_v40, %v217_v32  ;;  %v268_v47 = vadd.f32 %v260_v41, %v218_v33 }
  0x9e   : > { %v235_v36 = vpop.permute.xlu1 %234  ;;  %v239_v37 = vpop.permute.xlu0 %238 }
  0x9f   : > { %v263_v54 = vmul.f32 %v254_v26, %v235_v36  ;;  %v264_v55 = vmul.f32 %v258_v27, %v235_v36  ;;  %v265_v63 = vmul.f32 %v254_v26, %v239_v37  ;;  %v266_v0 = vmul.f32 %v258_v27, %v239_v37 }
  0xa1   : > { %v271_v3 = vadd.f32 %v263_v54, %v221_v60  ;;  %v272_v4 = vadd.f32 %v264_v55, %v222_v61  ;;  %v273_v20 = vadd.f32 %v265_v63, %v223_v12  ;;  %v274_v21 = vadd.f32 %v266_v0, %v224_v13 }
  0xa3   : > { %v277_v48 = vpop.permute.xlu1 %276  ;;  %v281_v49 = vpop.permute.xlu0 %280 }
  0xa4   : > { %v309_v50 = vmul.f32 %v304_v42, %v277_v48  ;;  %v310_v51 = vmul.f32 %v308_v43, %v277_v48  ;;  %v311_v52 = vmul.f32 %v304_v42, %v281_v49  ;;  %v312_v53 = vmul.f32 %v308_v43, %v281_v49 }
  0xa6   : > { %v816_v56 = vadd.f32 %v309_v50, %v267_v46  ;;  %v818_v57 = vadd.f32 %v310_v51, %v268_v47  ;;  %v820_v58 = vadd.f32 %v311_v52, %v269_v44  ;;  %v822_v59 = vadd.f32 %v312_v53, %v270_v45 }
  0xa7   : > { %v285_v62 = vpop.permute.xlu1 %284 }
  0xa8   : > { %v325_v1 = vmin.f32 %v816_v56, 20.0  ;;  %v326_v2 = vmin.f32 %v818_v57, 20.0  ;;  %v327_v5 = vmin.f32 %v820_v58, 20.0  ;;  %v328_v6 = vmin.f32 %v822_v59, 20.0 }
  0xa9   : > { %v313_v10 = vmul.f32 %v304_v42, %v285_v62  ;;  %v314_v11 = vmul.f32 %v308_v43, %v285_v62  ;;  %vm405_vm0 = vcmp.gt.f32.partialorder %v816_v56, 20.0  ;;  %vm406_vm1 = vcmp.gt.f32.partialorder %v818_v57, 20.0 }
  0xaa   : > { %v333_v7 = vmul.f32 1.442695, %v325_v1  ;;  %v335_v8 = vmul.f32 1.442695, %v326_v2  ;;  %v337_v9 = vmul.f32 1.442695, %v327_v5 }
  0xab   : > { %v339_v14 = vmul.f32 1.442695, %v328_v6  ;;  %v289_v15 = vpop.permute.xlu1 %288  ;;  %v828_v17 = vadd.f32 %v313_v10, %v271_v3  ;;  %v830_v18 = vadd.f32 %v314_v11, %v272_v4  ;;  %vm407_vm2 = vcmp.gt.f32.partialorder %v820_v58, 20.0 }
  0xac   : > { %613 = vpow2.f32 %v333_v7  ;;  %v315_v19 = vmul.f32 %v304_v42, %v289_v15  ;;  %v316_v22 = vmul.f32 %v308_v43, %v289_v15  ;;  %vm408_vm3 = vcmp.gt.f32.partialorder %v822_v59, 20.0 }
  0xad   : > { %615 = vpow2.f32 %v335_v8  ;;  %v329_v23 = vmin.f32 %v828_v17, 20.0  ;;  %v330_v24 = vmin.f32 %v830_v18, 20.0  ;;  %vm409_vm4 = vcmp.gt.f32.partialorder %v828_v17, 20.0 }
  0xae   : > { %617 = vpow2.f32 %v337_v9  ;;  %v834_v16 = vadd.f32 %v315_v19, %v273_v20  ;;  %v836_v25 = vadd.f32 %v316_v22, %v274_v21  ;;  %vm410_vm5 = vcmp.gt.f32.partialorder %v830_v18, 20.0 }
  0xaf   : > { %619 = vpow2.f32 %v339_v14  ;;  %v341_v26 = vmul.f32 1.442695, %v329_v23  ;;  %v343_v27 = vmul.f32 1.442695, %v330_v24 }
  0xb0   : > { %v331_v28 = vmin.f32 %v834_v16, 20.0  ;;  %v332_v29 = vmin.f32 %v836_v25, 20.0  ;;  %vm411_vm6 = vcmp.gt.f32.partialorder %v834_v16, 20.0  ;;  %vm412_vm7 = vcmp.gt.f32.partialorder %v836_v25, 20.0 }
  0xb1   : > { %621 = vpow2.f32 %v341_v26 }
  0xb2   : > { %623 = vpow2.f32 %v343_v27  ;;  %v345_v30 = vmul.f32 1.442695, %v331_v28  ;;  %v347_v31 = vmul.f32 1.442695, %v332_v29 }
  0xb4   : > { %625 = vpow2.f32 %v345_v30 }
  0xb5   : > { %627 = vpow2.f32 %v347_v31 }
  0xb9   : > { %v614_v32 = vpop.eup %613 }
  0xba   : > { %v616_v33 = vpop.eup %615  ;;  %v349_v34 = vadd.f32 1.0, %v614_v32 }
  0xbb   : > { %v618_v35 = vpop.eup %617  ;;  %v350_v36 = vadd.f32 1.0, %v616_v33 }
  0xbc   : > { %v620_v37 = vpop.eup %619  ;;  %v357_v38 = vmul.f32 %v349_v34, %v349_v34  ;;  %v351_v39 = vadd.f32 1.0, %v618_v35 }
  0xbd   : > { %v358_v40 = vmul.f32 %v350_v36, %v350_v36  ;;  %v352_v41 = vadd.f32 1.0, %v620_v37 }
  0xbe   : > { %v381_v42 = vadd.f32 1.0, %v357_v38  ;;  %v359_v43 = vmul.f32 %v351_v39, %v351_v39  ;;  %v622_v44 = vpop.eup %621  ;;  %v532_v3 = vadd.f32 -1.0, %v357_v38 }
  0xbf   : > { %v382_v45 = vadd.f32 1.0, %v358_v40  ;;  %v360_v46 = vmul.f32 %v352_v41, %v352_v41  ;;  %v624_v47 = vpop.eup %623  ;;  %v353_v51 = vadd.f32 1.0, %v622_v44  ;;  %v533_v4 = vadd.f32 -1.0, %v358_v40 }
  0xc0   : > { %629 = vrcp.f32 %v381_v42  ;;  %v383_v48 = vadd.f32 1.0, %v359_v43  ;;  %v354_v52 = vadd.f32 1.0, %v624_v47  ;;  %v534_v6 = vadd.f32 -1.0, %v359_v43 }
  0xc1   : > { %631 = vrcp.f32 %v382_v45  ;;  %v384_v49 = vadd.f32 1.0, %v360_v46  ;;  %v626_v50 = vpop.eup %625  ;;  %v361_v55 = vmul.f32 %v353_v51, %v353_v51  ;;  %v535_v7 = vadd.f32 -1.0, %v360_v46 }
  0xc2   : > { %633 = vrcp.f32 %v383_v48  ;;  %v628_v53 = vpop.eup %627  ;;  %v355_v54 = vadd.f32 1.0, %v626_v50  ;;  %v362_v60 = vmul.f32 %v354_v52, %v354_v52  ;;  %v373_v8 = vmul.f32 %v532_v3, %v816_v56 }
  0xc3   : > { %635 = vrcp.f32 %v384_v49  ;;  %v356_v61 = vadd.f32 1.0, %v628_v53  ;;  %v385_v63 = vadd.f32 1.0, %v361_v55  ;;  %v374_v11 = vmul.f32 %v533_v4, %v818_v57 }
  0xc4   : > { %v363_v62 = vmul.f32 %v355_v54, %v355_v54  ;;  %v386_v0 = vadd.f32 1.0, %v362_v60  ;;  %v375_v9 = vmul.f32 %v534_v6, %v820_v58  ;;  %v376_v19 = vmul.f32 %v535_v7, %v822_v59 }
  0xc5   : > { %v364_v1 = vmul.f32 %v356_v61, %v356_v61  ;;  %637 = vrcp.f32 %v385_v63  ;;  %v536_v23 = vadd.f32 -1.0, %v361_v55  ;;  %v537_v27 = vadd.f32 -1.0, %v362_v60 }
  0xc6   : > { %v387_v2 = vadd.f32 1.0, %v363_v62  ;;  %639 = vrcp.f32 %v386_v0  ;;  %v538_v28 = vadd.f32 -1.0, %v363_v62 }
  0xc7   : > { %v388_v5 = vadd.f32 1.0, %v364_v1  ;;  %v539_v29 = vadd.f32 -1.0, %v364_v1  ;;  %v377_v30 = vmul.f32 %v536_v23, %v828_v17  ;;  %v378_v32 = vmul.f32 %v537_v27, %v830_v18 }
  0xc8   : > { %641 = vrcp.f32 %v387_v2  ;;  %v379_v35 = vmul.f32 %v538_v28, %v834_v16 }
  0xc9   : > { %643 = vrcp.f32 %v388_v5 }
  0xcd   : > { %v630_v10 = vpop.eup %629 }
  0xce   : > { %v632_v12 = vpop.eup %631  ;;  %v390_v13 = vmul.f32 %v630_v10, %v373_v8 }
  0xcf   : > { %v634_v14 = vpop.eup %633  ;;  %v392_v15 = vmul.f32 %v632_v12, %v374_v11 }
  0xd0   : > { %v636_v20 = vpop.eup %635  ;;  %v413_v21 = vsel %vm405_vm0, %v816_v56, %v390_v13  ;;  %v394_v22 = vmul.f32 %v634_v14, %v375_v9 }
  0xd1   : > { %v414_v24 = vsel %vm406_vm1, %v818_v57, %v392_v15  ;;  %421 = vst [vmem:[%s851_s16] sm:$0xff] %v413_v21  ;;  %v396_v26 = vmul.f32 %v636_v20, %v376_v19 }
  0xd2   : > { %422 = vst [vmem:[%s851_s16 + $0x8] sm:$0xff] %v414_v24  ;;  %v415_v56 = vsel %vm407_vm2, %v820_v58, %v394_v22  ;;  %v638_v31 = vpop.eup %637 }
  0xd3   : > { %v416_v57 = vsel %vm408_vm3, %v822_v59, %v396_v26  ;;  %423 = vst [vmem:[%s851_s16 + $0x10] sm:$0xff] %v415_v56  ;;  %v640_v33 = vpop.eup %639  ;;  %v398_v34 = vmul.f32 %v638_v31, %v377_v30  ;;  %v380_v59 = vmul.f32 %v539_v29, %v836_v25 }
  0xd4   : > { %424 = vst [vmem:[%s851_s16 + $0x18] sm:$0xff] %v416_v57  ;;  %v400_v36 = vmul.f32 %v640_v33, %v378_v32 }
  0xd5   : > { %v642_v58 = vpop.eup %641  ;;  %v417_v38 = vsel %vm409_vm4, %v828_v17, %v398_v34 }
  0xd6   : > { %v644_v37 = vpop.eup %643  ;;  %v402_v39 = vmul.f32 %v642_v58, %v379_v35  ;;  %v418_v40 = vsel %vm410_vm5, %v830_v18, %v400_v36  ;;  %425 = vst [vmem:[%s851_s16 + $0x20] sm:$0xff] %v417_v38 }
  0xd7   : > { %v404_v41 = vmul.f32 %v644_v37, %v380_v59  ;;  %426 = vst [vmem:[%s851_s16 + $0x28] sm:$0xff] %v418_v40 }
  0xd8   : > { %v419_v17 = vsel %vm411_vm6, %v834_v16, %v402_v39 }
  0xd9   : > { %v420_v18 = vsel %vm412_vm7, %v836_v25, %v404_v41  ;;  %427 = vst [vmem:[%s851_s16 + $0x30] sm:$0xff] %v419_v17 }
  0xda   : > { %428 = vst [vmem:[%s851_s16 + $0x38] sm:$0xff] %v420_v18 }
  0xdb   : > { %658 = shalt.err (!%p655_p5)
}
  0xdc   : > { %s659_s30 = scalar_lea.hbm %s876_s24, 1024  ;;  %s663_s5 = scalar_lea.hbm %s935_s2, 2048 }
  0xdd   : > { %p660_p6 = scmp.ne.s32.totalorder %s876_s24, %s659_s30  ;;  %p664_p10 = scmp.lt.s32.totalorder %s876_s24, %s935_s2 }
  0xde   : > { %p665_p11 = scmp.lt.s32.totalorder %s663_s5, %s659_s30 }
  0xdf   : > { %p661_p7 = pnand %p660_p6, %p784_p4 }
  0xe0   : > { %p666_p12 = por %p665_p11, %p664_p10 }
  0xe1   : > { %p662_p9 = pneg %p661_p7 }
  0xe3   : > { %p667_p13 = pnand %p666_p12, %p662_p9 }
  0xe5   : > { %670 = shalt.err (!%p667_p13)
}
  0xe6   : > { %s727_s8 = smov 256   ;;  %s728_s15 = smov 16  }
  0xe7   : > { %547 = dma.vmem_to_hbm [thread:$0]  (%p784_p4), %s878_s20, 1024, %s876_s24, %s888_s25, %s727_s8, %s727_s8, %s728_s15  }
  0xe8 PF: > { %p553_p0 = scmp.ge.s32.totalorder %s721_s14, 2  ;;  %s460_s16 = sand.u32 1, %s701_s9  }
  0xe9   : > { %s461_s18 = scalar_lea.sflag [#allocation3], %s460_s16 }
  0xea   : > { %p550_p1 = pnand %p553_p0, %p791_p8 }
  0xec   : > { %p551_p2 = pneg %p550_p1 }
  0xee   : > { %696 = dma.done.wait (%p551_p2), %s461_s18, 1024  }
  0xef   : > { %698 = vsyncadd (%p551_p2), %s461_s18, 4294966272  ;;  %s15_s14 = sadd.s32 1, %s721_s14   ;;  %s938_s9 = smov %s705_s10 }
  0xf0   : > { %p12_p3 = scmp.ge.s32.totalorder %s15_s14, 4   ;;  %s939_s10 = smov %s709_s11 }
  0xf1   : > { %s940_s11 = smov %s797_s22  ;;  %s941_s12 = smov %s717_s13 }
  0xf2   : > { %s942_s13 = smov %s944_s17  ;;  %14 = sbr.rel (!%p12_p3) target bundleno = 4 (0x4), region = 63 }
  0xf7   :  { %466 = vsyncpa [#allocation3], 1 }
  0xf8   :  { %468 = vsyncpa [#allocation3 + $0x1], 1 }

</bundles_post_ra>
